<compile_context>
chip_gen: v5e
topology: v5e:2x2
jax: 0.10.0
libtpu: 0.0.40
codegen_flags: <defaults>
</compile_context>

<pallas_src>
import jax
import jax.numpy as jnp
from jax.experimental import pallas as pl
from jax.experimental.pallas import tpu as pltpu

EMB_DIM = 768       # nn.Embedding(3, 768)
HID_DIM = 384       # Linear(768, 384)
N_STYLES = 3        # safe / balanced / creative
SCORE_LANES = 128   # lane-dense score output width (sliced to 1 in wrapper)


def _full_spec(shape):
    """BlockSpec covering the whole array (grid=() single-shot)."""
    return pl.BlockSpec(shape, lambda: (0,) * len(shape))


# ----------------------------------------------------------------------------
# One-shot (parameter-load time) kernel: diversity-controller MLP evaluated on
# the 3-row creativity-embedding table.  Runs once; never on the per-call path.
# ----------------------------------------------------------------------------
def _score_table_kernel(emb_ref, w1_ref, b1_ref, w2_ref, b2_ref, out_ref):
    """sigmoid(w2 . relu(emb_tbl @ w1 + b1) + b2) for all 3 styles.

    emb_ref : (3, 768)   f32
    w1_ref  : (768, 384) f32
    b1_ref  : (1, 384)   f32
    w2_ref  : (1, 384)   f32   second Linear weight, lane-dense layout
    b2_ref  : (1,)       f32   SMEM scalar
    out_ref : (3, 128)   f32   score broadcast across lanes
    """
    h = jnp.dot(emb_ref[...], w1_ref[...],
                preferred_element_type=jnp.float32) + b1_ref[...]     # (3, 384)
    h = jnp.maximum(h, 0.0)
    # Second Linear as lane-dense VPU mul + XLU lane-reduce (no N=1 MXU pass).
    z = jnp.sum(h * w2_ref[...], axis=-1, keepdims=True) + b2_ref[0]  # (3, 1)
    out_ref[...] = jnp.broadcast_to(jax.nn.sigmoid(z), out_ref.shape)


@jax.jit
def precompute_score_table(emb_table, w1, b1, w2, b2):
    """Evaluate the diversity controller on the 3 embedding rows. Returns (3,)."""
    b1_2d = b1.reshape(1, HID_DIM).astype(jnp.float32)
    w2_row = w2.reshape(1, HID_DIM).astype(jnp.float32)   # (384,1) -> (1,384)
    b2_1d = b2.reshape(1).astype(jnp.float32)

    score_pad = pl.pallas_call(
        _score_table_kernel,
        out_shape=jax.ShapeDtypeStruct((N_STYLES, SCORE_LANES), jnp.float32),
        grid=(),
        in_specs=[
            _full_spec((N_STYLES, EMB_DIM)),
            _full_spec((EMB_DIM, HID_DIM)),
            _full_spec((1, HID_DIM)),
            _full_spec((1, HID_DIM)),
            pl.BlockSpec(memory_space=pltpu.MemorySpace.SMEM),
        ],
        out_specs=_full_spec((N_STYLES, SCORE_LANES)),
    )(emb_table.astype(jnp.float32), w1.astype(jnp.float32), b1_2d, w2_row, b2_1d)
    return score_pad[:, 0]                                            # (3,)


# ----------------------------------------------------------------------------
# Per-call kernel: embedding lookup + score selection via VPU selects.
# ----------------------------------------------------------------------------
def _forward_kernel(idx_ref, emb_ref, stbl_ref, emb_out_ref, score_ref):
    """Creativity-embedding gather + diversity-score select.

    idx_ref    : (B, 1)   int32  creativity level in {0,1,2}
    emb_ref    : (3, 768) f32    embedding table
    stbl_ref   : (3,)     f32    precomputed score table (SMEM)
    emb_out_ref: (B, 768) f32
    score_ref  : (B, 128) f32    score broadcast across lanes
    """
    idx = idx_ref[...]                        # (B, 1) int32
    m0 = idx == 0                             # (B, 1) bool
    m1 = idx == 1

    # Embedding lookup: 3-way select on the VPU (bit-exact, no K=3 MXU pass).
    emb_out_ref[...] = jnp.where(
        m0, emb_ref[0:1, :],
        jnp.where(m1, emb_ref[1:2, :], emb_ref[2:3, :]))

    # Score selection from the SMEM table; lane-dense store.
    sel = jnp.where(m0, stbl_ref[0], jnp.where(m1, stbl_ref[1], stbl_ref[2]))
    score_ref[...] = jnp.broadcast_to(sel, score_ref.shape)


@jax.jit
def creativity_controlled_paraphraser(creativity_idx, emb_table, score_table):
    """Per-call path. creativity_idx: (B,) int32 with values in {0,1,2}."""
    B = creativity_idx.shape[0]
    idx2d = creativity_idx.astype(jnp.int32).reshape(B, 1)

    emb_out, score_pad = pl.pallas_call(
        _forward_kernel,
        out_shape=(
            jax.ShapeDtypeStruct((B, EMB_DIM), jnp.float32),
            jax.ShapeDtypeStruct((B, SCORE_LANES), jnp.float32),
        ),
        grid=(),
        in_specs=[
            _full_spec((B, 1)),
            _full_spec((N_STYLES, EMB_DIM)),
            pl.BlockSpec(memory_space=pltpu.MemorySpace.SMEM),
        ],
        out_specs=(
            _full_spec((B, EMB_DIM)),
            _full_spec((B, SCORE_LANES)),
        ),
    )(idx2d, emb_table.astype(jnp.float32), score_table)
    return emb_out, score_pad[:, :1]


# ----------------------------------------------------------------------------
# Pure-JAX reference (f32 end to end, same as the PyTorch module's math).
# ----------------------------------------------------------------------------
def _reference(creativity_idx, emb_table, w1, b1, w2, b2):
    emb = emb_table[creativity_idx]                       # (B, 768)
    h = jnp.maximum(emb @ w1 + b1, 0.0)                   # (B, 384)
    score = jax.nn.sigmoid(h @ w2 + b2.reshape(1, 1))     # (B, 1)
    return emb, score


if __name__ == "__main__":
    key = jax.random.PRNGKey(0)
    k_emb, k_w1, k_b1, k_w2, k_b2 = jax.random.split(key, 5)

    # Deterministic "parameters" (mimic nn.Embedding / nn.Linear shapes).
    emb_table = jax.random.normal(k_emb, (N_STYLES, EMB_DIM), jnp.float32)
    w1 = jax.random.normal(k_w1, (EMB_DIM, HID_DIM), jnp.float32) * 0.02
    b1 = jax.random.normal(k_b1, (HID_DIM,), jnp.float32) * 0.02
    w2 = jax.random.normal(k_w2, (HID_DIM, 1), jnp.float32) * 0.02
    b2 = jax.random.normal(k_b2, (1,), jnp.float32) * 0.02

    # Parameter-load time: precompute the 3-entry diversity-score table once.
    score_table = precompute_score_table(emb_table, w1, b1, w2, b2)
    jax.block_until_ready(score_table)

    # Batch of 8 creativity-level requests (0=safe, 1=balanced, 2=creative).
    creativity_idx = jnp.array([0, 1, 2, 1, 0, 2, 1, 1], dtype=jnp.int32)

    emb_out, score = creativity_controlled_paraphraser(
        creativity_idx, emb_table, score_table)
    jax.block_until_ready((emb_out, score))

    ref_emb, ref_score = _reference(creativity_idx, emb_table, w1, b1, w2, b2)
    assert emb_out.shape == (8, EMB_DIM) and score.shape == (8, 1)
    assert jnp.array_equal(emb_out, ref_emb)                      # exact selects
    assert jnp.allclose(score, ref_score, atol=1e-4, rtol=1e-4)

    # Extra coverage: batch not a multiple of 8 (sublane padding path).
    idx5 = jnp.array([2, 0, 1, 2, 0], dtype=jnp.int32)
    emb5, score5 = creativity_controlled_paraphraser(idx5, emb_table, score_table)
    jax.block_until_ready((emb5, score5))
    ref_emb5, ref_score5 = _reference(idx5, emb_table, w1, b1, w2, b2)
    assert jnp.array_equal(emb5, ref_emb5)
    assert jnp.allclose(score5, ref_score5, atol=1e-4, rtol=1e-4)

    print("KERNEL_OK")
</pallas_src>

<mosaic_0001>
module attributes {stable_mosaic.version = 11 : i64} {
  func.func @_score_table_kernel(%arg0: memref<3x768xf32, #tpu.memory_space<vmem>>, %arg1: memref<768x384xf32, #tpu.memory_space<vmem>>, %arg2: memref<1x384xf32, #tpu.memory_space<vmem>>, %arg3: memref<1x384xf32, #tpu.memory_space<vmem>>, %arg4: memref<1xf32, #tpu.memory_space<smem>>, %arg5: memref<3x128xf32, #tpu.memory_space<vmem>>) attributes {dimension_semantics = [], scalar_prefetch = 0 : i64, scratch_operands = 0 : i64, tpu.core_type = #tpu.core_type<tc>} {
    %c0 = arith.constant 0 : index
    %c0_0 = arith.constant 0 : index
    %0 = vector.load %arg0[%c0, %c0_0] : memref<3x768xf32, #tpu.memory_space<vmem>>, vector<3x768xf32>
    %c0_1 = arith.constant 0 : index
    %c0_2 = arith.constant 0 : index
    %1 = vector.load %arg1[%c0_1, %c0_2] : memref<768x384xf32, #tpu.memory_space<vmem>>, vector<768x384xf32>
    %cst = arith.constant dense<0.000000e+00> : vector<3x384xf32>
    %2 = tpu.matmul %0, %1, %cst {dimension_numbers = #tpu.dot_dimension_numbers<[1], [0], [0], [1], [0, 0, 1, 1], [], []>} : vector<3x768xf32>, vector<768x384xf32>, vector<3x384xf32> -> vector<3x384xf32>
    %c0_3 = arith.constant 0 : index
    %c0_4 = arith.constant 0 : index
    %3 = vector.load %arg2[%c0_3, %c0_4] : memref<1x384xf32, #tpu.memory_space<vmem>>, vector<1x384xf32>
    %4 = vector.broadcast %3 : vector<1x384xf32> to vector<3x384xf32>
    %5 = arith.addf %2, %4 : vector<3x384xf32>
    %cst_5 = arith.constant 0.000000e+00 : f32
    %6 = vector.broadcast %cst_5 : f32 to vector<3x384xf32>
    %7 = arith.maximumf %5, %6 : vector<3x384xf32>
    %c0_6 = arith.constant 0 : index
    %c0_7 = arith.constant 0 : index
    %8 = vector.load %arg3[%c0_6, %c0_7] : memref<1x384xf32, #tpu.memory_space<vmem>>, vector<1x384xf32>
    %9 = vector.broadcast %8 : vector<1x384xf32> to vector<3x384xf32>
    %10 = arith.mulf %7, %9 : vector<3x384xf32>
    %cst_8 = arith.constant dense<0.000000e+00> : vector<3xf32>
    %11 = vector.multi_reduction <add>, %10, %cst_8 [1] : vector<3x384xf32> to vector<3xf32>
    %12 = vector.shape_cast %11 : vector<3xf32> to vector<3x1xf32>
    %c0_9 = arith.constant 0 : index
    %13 = memref.load %arg4[%c0_9] : memref<1xf32, #tpu.memory_space<smem>>
    %14 = vector.broadcast %13 : f32 to vector<3x1xf32>
    %15 = arith.addf %12, %14 : vector<3x1xf32>
    %16 = arith.negf %15 : vector<3x1xf32>
    %17 = math.exp %16 : vector<3x1xf32>
    %cst_10 = arith.constant 1.000000e+00 : f32
    %18 = vector.broadcast %cst_10 : f32 to vector<3x1xf32>
    %19 = arith.addf %18, %17 : vector<3x1xf32>
    %20 = arith.divf %18, %19 : vector<3x1xf32>
    %21 = vector.shape_cast %20 : vector<3x1xf32> to vector<3x1xf32>
    %22 = vector.broadcast %21 : vector<3x1xf32> to vector<3x128xf32>
    %c0_11 = arith.constant 0 : index
    %c0_12 = arith.constant 0 : index
    %23 = vector.load %arg5[%c0_11, %c0_12] : memref<3x128xf32, #tpu.memory_space<vmem>>, vector<3x128xf32>
    tpu.vector_store %arg5[%c0_11, %c0_12], %22 {strides = array<i32>} : memref<3x128xf32, #tpu.memory_space<vmem>>, vector<3x128xf32>,
    return
  }
}

</mosaic_0001>

<bundles_post_ra>
// kernel: precompute_score_table.1
= control target key start
LH: loop header
LB: loop body
LE: loop exit
PB: predicated region body
PF: predicated region fallthrough
CT: control target
= control target key end

     0   :  { %11 = vsyncpa [#allocation4], 0  ;;  %s963_s0 = inlined_call_operand.hbm [shape: f32[3,768], index: 0, kind: input, shape index: {}]   ;;  %s964_s1 = inlined_call_operand.hbm [shape: f32[768,384], index: 1, kind: input, shape index: {}]   ;;  %s965_s2 = inlined_call_operand.vmem [shape: f32[1,384], index: 2, kind: input, shape index: {}]   ;;  %s966_s3 = inlined_call_operand.hbm [shape: f32[1,384], index: 3, kind: input, shape index: {}]   ;;  %s967_s4 = inlined_call_operand.<no memory space> [shape: f32[1], index: 4, kind: input, shape index: {}]   ;;  %s968_s5 = inlined_call_operand.vmem [shape: f32[3,128], index: 5, kind: output, shape index: {}]  }
   0x1   :  { %12 = vsyncpa [#allocation6], 0  ;;  %s28_s20 = sshll.u32 %s964_s1, 4  ;;  %s880_s21 = smov [#allocation5]   ;;  %s29_s20 = int_to_ptr.hbm [resolvable:$true] %s28_s20 }
   0x2   :  { %s30_s22 = sshll.u32 %s880_s21, 4  ;;  %s18_s25 = sshll.u32 %s963_s0, 4  ;;  %s31_s22 = int_to_ptr.vmem [resolvable:$true] %s30_s22  ;;  %s19_s25 = int_to_ptr.hbm [resolvable:$true] %s18_s25 }
   0x3   :  { %s881_s26 = smov 384   ;;  %s882_s27 = smov 24  }
   0x4   :  { %36 = dma.hbm_to_vmem [thread:$0]  %s29_s20, 36864, %s31_s22, [#allocation6], %s881_s26, %s881_s26, %s882_s27  }
   0x5   :  { %s883_s28 = smov [#allocation3]   ;;  %s44_s7 = sshll.u32 %s966_s3, 4  ;;  %s45_s7 = int_to_ptr.hbm [resolvable:$true] %s44_s7 }
   0x6   :  { %s20_s29 = sshll.u32 %s883_s28, 4  ;;  %s884_s1 = smov [#allocation7]   ;;  %s21_s29 = int_to_ptr.vmem [resolvable:$true] %s20_s29 }
   0x7   :  { %23 = dma.hbm_to_vmem [thread:$0]  %s19_s25, 384, %s21_s29, [#allocation4]  }
   0x8   :  { %s46_s8 = sshll.u32 %s884_s1, 4  ;;  %s47_s8 = int_to_ptr.vmem [resolvable:$true] %s46_s8 }
   0x9   :  { %49 = dma.hbm_to_vmem [thread:$0]  %s45_s7, 48, %s47_s8, [#allocation6]  }
   0xa   :  { %876 = dma.done.wait [#allocation4], 384  }
   0xb   :  { %877 = vsyncadd [#allocation4], 4294966912 }
   0xc   :  { %878 = dma.done.wait [#allocation6], 36912  }
   0xd   :  { %879 = vsyncadd [#allocation6], 4294930384  ;;  %v112_v0 = vld [vmem:[#allocation5 + $0x168] sm:$0xff]  ;;  %v109_v2 = vld [vmem:[#allocation5 + $0x150] sm:$0xff]  ;;  %vm757_vm0 = vcmask 1042432  }
   0xe   :  { %v208_v1 = vld [vmem:[#allocation5 + $0x468] sm:$0xff]  ;;  %383 = vmatpush.msra.mxu0 %v112_v0  ;;  %v205_v4 = vld [vmem:[#allocation5 + $0x450] sm:$0xff]  ;;  %v106_v6 = vld [vmem:[#allocation5 + $0x138] sm:$0xff] }
   0xf   :  { %423 = vmatpush.msra.mxu2 %v208_v1  ;;  %v160_v3 = vld [vmem:[#allocation5 + $0x2e8] sm:$0xff]  ;;  %v157_v7 = vld [vmem:[#allocation5 + $0x2d0] sm:$0xff]  ;;  %v202_v8 = vld [vmem:[#allocation5 + $0x438] sm:$0xff] }
  0x10   :  { %v256_v5 = vld [vmem:[#allocation5 + $0x5e8] sm:$0xff]  ;;  %403 = vmatpush.msra.mxu1 %v160_v3  ;;  %384 = vmatpush.msra.mxu0 %v109_v2  ;;  %v253_v9 = vld [vmem:[#allocation5 + $0x5d0] sm:$0xff]  ;;  %v154_v10 = vld [vmem:[#allocation5 + $0x2b8] sm:$0xff] }
  0x11   :  { %443 = vmatpush.msra.mxu3 %v256_v5  ;;  %424 = vmatpush.msra.mxu2 %v205_v4  ;;  %v103_v11 = vld [vmem:[#allocation5 + $0x120] sm:$0xff]  ;;  %v250_v13 = vld [vmem:[#allocation5 + $0x5b8] sm:$0xff]  ;;  %v100_v16 = vld [vmem:[#allocation5 + $0x108] sm:$0xff] }
  0x12   :  { %404 = vmatpush.msra.mxu1 %v157_v7  ;;  %v199_v12 = vld [vmem:[#allocation5 + $0x420] sm:$0xff]  ;;  %385 = vmatpush.msra.mxu0 %v106_v6  ;;  %v196_v17 = vld [vmem:[#allocation5 + $0x408] sm:$0xff]  ;;  %v97_v20 = vld [vmem:[#allocation5 + $0xf0] sm:$0xff] }
  0x13   :  { %444 = vmatpush.msra.mxu3 %v253_v9  ;;  %425 = vmatpush.msra.mxu2 %v202_v8  ;;  %v151_v14 = vld [vmem:[#allocation5 + $0x2a0] sm:$0xff]  ;;  %v148_v18 = vld [vmem:[#allocation5 + $0x288] sm:$0xff]  ;;  %v193_v21 = vld [vmem:[#allocation5 + $0x3f0] sm:$0xff] }
  0x14   :  { %v247_v15 = vld [vmem:[#allocation5 + $0x5a0] sm:$0xff]  ;;  %405 = vmatpush.msra.mxu1 %v154_v10  ;;  %386 = vmatpush.msra.mxu0 %v103_v11  ;;  %v244_v19 = vld [vmem:[#allocation5 + $0x588] sm:$0xff]  ;;  %v145_v22 = vld [vmem:[#allocation5 + $0x270] sm:$0xff] }
  0x15   :  { %445 = vmatpush.msra.mxu3 %v250_v13  ;;  %426 = vmatpush.msra.mxu2 %v199_v12  ;;  %v241_v23 = vld [vmem:[#allocation5 + $0x570] sm:$0xff]  ;;  %v94_v24 = vld [vmem:[#allocation5 + $0xd8] sm:$0xff]  ;;  %v91_v28 = vld [vmem:[#allocation5 + $0xc0] sm:$0xff] }
  0x16   :  { %406 = vmatpush.msra.mxu1 %v151_v14  ;;  %387 = vmatpush.msra.mxu0 %v100_v16  ;;  %v190_v25 = vld [vmem:[#allocation5 + $0x3d8] sm:$0xff]  ;;  %v187_v29 = vld [vmem:[#allocation5 + $0x3c0] sm:$0xff]  ;;  %v88_v32 = vld [vmem:[#allocation5 + $0xa8] sm:$0xff] }
  0x17   :  { %446 = vmatpush.msra.mxu3 %v247_v15  ;;  %427 = vmatpush.msra.mxu2 %v196_v17  ;;  %v142_v26 = vld [vmem:[#allocation5 + $0x258] sm:$0xff]  ;;  %v139_v30 = vld [vmem:[#allocation5 + $0x240] sm:$0xff]  ;;  %v184_v33 = vld [vmem:[#allocation5 + $0x3a8] sm:$0xff] }
  0x18   :  { %407 = vmatpush.msra.mxu1 %v148_v18  ;;  %388 = vmatpush.msra.mxu0 %v97_v20  ;;  %v238_v27 = vld [vmem:[#allocation5 + $0x558] sm:$0xff]  ;;  %v235_v31 = vld [vmem:[#allocation5 + $0x540] sm:$0xff]  ;;  %v136_v34 = vld [vmem:[#allocation5 + $0x228] sm:$0xff] }
  0x19   :  { %447 = vmatpush.msra.mxu3 %v244_v19  ;;  %428 = vmatpush.msra.mxu2 %v193_v21  ;;  %v232_v35 = vld [vmem:[#allocation5 + $0x528] sm:$0xff]  ;;  %v85_v36 = vld [vmem:[#allocation5 + $0x90] sm:$0xff]  ;;  %v82_v40 = vld [vmem:[#allocation5 + $0x78] sm:$0xff] }
  0x1a   :  { %408 = vmatpush.msra.mxu1 %v145_v22  ;;  %389 = vmatpush.msra.mxu0 %v94_v24  ;;  %v181_v37 = vld [vmem:[#allocation5 + $0x390] sm:$0xff]  ;;  %v178_v41 = vld [vmem:[#allocation5 + $0x378] sm:$0xff]  ;;  %v79_v44 = vld [vmem:[#allocation5 + $0x60] sm:$0xff] }
  0x1b   :  { %448 = vmatpush.msra.mxu3 %v241_v23  ;;  %429 = vmatpush.msra.mxu2 %v190_v25  ;;  %v133_v38 = vld [vmem:[#allocation5 + $0x210] sm:$0xff]  ;;  %v130_v42 = vld [vmem:[#allocation5 + $0x1f8] sm:$0xff]  ;;  %v175_v45 = vld [vmem:[#allocation5 + $0x360] sm:$0xff] }
  0x1c   :  { %409 = vmatpush.msra.mxu1 %v142_v26  ;;  %390 = vmatpush.msra.mxu0 %v91_v28  ;;  %v229_v39 = vld [vmem:[#allocation5 + $0x510] sm:$0xff]  ;;  %v226_v43 = vld [vmem:[#allocation5 + $0x4f8] sm:$0xff]  ;;  %v127_v46 = vld [vmem:[#allocation5 + $0x1e0] sm:$0xff] }
  0x1d   :  { %449 = vmatpush.msra.mxu3 %v238_v27  ;;  %430 = vmatpush.msra.mxu2 %v187_v29  ;;  %v223_v47 = vld [vmem:[#allocation5 + $0x4e0] sm:$0xff]  ;;  %v76_v48 = vld [vmem:[#allocation5 + $0x48] sm:$0xff]  ;;  %v73_v52 = vld [vmem:[#allocation5 + $0x30] sm:$0xff] }
  0x1e   :  { %410 = vmatpush.msra.mxu1 %v139_v30  ;;  %391 = vmatpush.msra.mxu0 %v88_v32  ;;  %v172_v49 = vld [vmem:[#allocation5 + $0x348] sm:$0xff]  ;;  %v169_v53 = vld [vmem:[#allocation5 + $0x330] sm:$0xff]  ;;  %v70_v56 = vld [vmem:[#allocation5 + $0x18] sm:$0xff] }
  0x1f   :  { %450 = vmatpush.msra.mxu3 %v235_v31  ;;  %431 = vmatpush.msra.mxu2 %v184_v33  ;;  %v124_v50 = vld [vmem:[#allocation5 + $0x1c8] sm:$0xff]  ;;  %v121_v54 = vld [vmem:[#allocation5 + $0x1b0] sm:$0xff]  ;;  %v166_v57 = vld [vmem:[#allocation5 + $0x318] sm:$0xff] }
  0x20   :  { %411 = vmatpush.msra.mxu1 %v136_v34  ;;  %392 = vmatpush.msra.mxu0 %v85_v36  ;;  %v220_v51 = vld [vmem:[#allocation5 + $0x4c8] sm:$0xff]  ;;  %v217_v55 = vld [vmem:[#allocation5 + $0x4b0] sm:$0xff]  ;;  %v118_v58 = vld [vmem:[#allocation5 + $0x198] sm:$0xff] }
  0x21   :  { %451 = vmatpush.msra.mxu3 %v232_v35  ;;  %432 = vmatpush.msra.mxu2 %v181_v37  ;;  %v214_v59 = vld [vmem:[#allocation5 + $0x498] sm:$0xff]  ;;  %v67_v60 = vld [vmem:[#allocation5] sm:$0xff]  ;;  %v304_v62 = vld [vmem:[#allocation5 + $0x768] sm:$0xff] }
  0x22   :  { %412 = vmatpush.msra.mxu1 %v133_v38  ;;  %393 = vmatpush.msra.mxu0 %v82_v40  ;;  %v163_v61 = vld [vmem:[#allocation5 + $0x300] sm:$0xff]  ;;  %v113_v63 = vld [vmem:[#allocation5 + $0x170] sm:$0xff]  ;;  %v352_v3 = vld [vmem:[#allocation5 + $0x8e8] sm:$0xff] }
  0x23   :  { %452 = vmatpush.msra.mxu3 %v229_v39  ;;  %433 = vmatpush.msra.mxu2 %v178_v41  ;;  %v115_v0 = vld [vmem:[#allocation5 + $0x180] sm:$0xff]  ;;  %v301_v2 = vld [vmem:[#allocation5 + $0x750] sm:$0xff]  ;;  %v110_v4 = vld [vmem:[#allocation5 + $0x158] sm:$0xff] }
  0x24   :  { %413 = vmatpush.msra.mxu1 %v130_v42  ;;  %394 = vmatpush.msra.mxu0 %v79_v44  ;;  %v211_v1 = vld [vmem:[#allocation5 + $0x480] sm:$0xff]  ;;  %v161_v5 = vld [vmem:[#allocation5 + $0x2f0] sm:$0xff]  ;;  %v298_v6 = vld [vmem:[#allocation5 + $0x738] sm:$0xff] }
  0x25   :  { %453 = vmatpush.msra.mxu3 %v226_v43  ;;  %434 = vmatpush.msra.mxu2 %v175_v45  ;;  %v349_v7 = vld [vmem:[#allocation5 + $0x8d0] sm:$0xff]  ;;  %v107_v8 = vld [vmem:[#allocation5 + $0x140] sm:$0xff]  ;;  %v158_v9 = vld [vmem:[#allocation5 + $0x2d8] sm:$0xff] }
  0x26   :  { %414 = vmatpush.msra.mxu1 %v127_v46  ;;  %395 = vmatpush.msra.mxu0 %v76_v48  ;;  %v295_v10 = vld [vmem:[#allocation5 + $0x720] sm:$0xff]  ;;  %v346_v11 = vld [vmem:[#allocation5 + $0x8b8] sm:$0xff]  ;;  %v104_v12 = vld [vmem:[#allocation5 + $0x128] sm:$0xff] }
  0x27   :  { %454 = vmatpush.msra.mxu3 %v223_v47  ;;  %435 = vmatpush.msra.mxu2 %v172_v49  ;;  %v155_v13 = vld [vmem:[#allocation5 + $0x2c0] sm:$0xff]  ;;  %v292_v14 = vld [vmem:[#allocation5 + $0x708] sm:$0xff]  ;;  %v101_v16 = vld [vmem:[#allocation5 + $0x110] sm:$0xff] }
  0x28   :  { %415 = vmatpush.msra.mxu1 %v124_v50  ;;  %396 = vmatpush.msra.mxu0 %v73_v52  ;;  %v343_v15 = vld [vmem:[#allocation5 + $0x8a0] sm:$0xff]  ;;  %v152_v17 = vld [vmem:[#allocation5 + $0x2a8] sm:$0xff]  ;;  %v289_v18 = vld [vmem:[#allocation5 + $0x6f0] sm:$0xff] }
  0x29   :  { %455 = vmatpush.msra.mxu3 %v220_v51  ;;  %436 = vmatpush.msra.mxu2 %v169_v53  ;;  %v340_v19 = vld [vmem:[#allocation5 + $0x888] sm:$0xff]  ;;  %v98_v20 = vld [vmem:[#allocation5 + $0xf8] sm:$0xff]  ;;  %v149_v21 = vld [vmem:[#allocation5 + $0x290] sm:$0xff] }
  0x2a   :  { %416 = vmatpush.msra.mxu1 %v121_v54  ;;  %397 = vmatpush.msra.mxu0 %v70_v56  ;;  %v65_v22 = vld [vmem:[#allocation3 + $0x8] sm:$0x77]  ;;  %v286_v23 = vld [vmem:[#allocation5 + $0x6d8] sm:$0xff]  ;;  %v95_v25 = vld [vmem:[#allocation5 + $0xe0] sm:$0xff] }
  0x2b   :  { %456 = vmatpush.msra.mxu3 %v217_v55  ;;  %437 = vmatpush.msra.mxu2 %v166_v57  ;;  %v337_v24 = vld [vmem:[#allocation5 + $0x870] sm:$0xff]  ;;  %368 = vst [vmem:[#allocation1 + $0x10] ss:$2 sm:$0xff] %v65_v22  ;;  %v146_v26 = vld [vmem:[#allocation5 + $0x278] sm:$0xff]  ;;  %v64_v27 = vld [vmem:[#allocation3] sm:$0x77] }
  0x2c   :  { %417 = vmatpush.msra.mxu1 %v118_v58  ;;  %398 = vmatpush.msra.mxu0 %v67_v60  ;;  %v283_v28 = vld [vmem:[#allocation5 + $0x6c0] sm:$0xff]  ;;  %v334_v29 = vld [vmem:[#allocation5 + $0x858] sm:$0xff]  ;;  %366 = vst [vmem:[#allocation1] ss:$2 sm:$0xff] %v64_v27  ;;  %v92_v30 = vld [vmem:[#allocation5 + $0xc8] sm:$0xff] }
  0x2d   :  { %457 = vmatpush.msra.mxu3 %v214_v59  ;;  %438 = vmatpush.msra.mxu2 %v163_v61  ;;  %v143_v31 = vld [vmem:[#allocation5 + $0x260] sm:$0xff]  ;;  %v280_v32 = vld [vmem:[#allocation5 + $0x6a8] sm:$0xff]  ;;  %v89_v34 = vld [vmem:[#allocation5 + $0xb0] sm:$0xff] }
  0x2e   :  { %463 = vmatpush.msrb.mxu0 %v304_v62  ;;  %418 = vmatpush.msra.mxu1 %v115_v0  ;;  %v331_v33 = vld [vmem:[#allocation5 + $0x840] sm:$0xff]  ;;  %v140_v35 = vld [vmem:[#allocation5 + $0x248] sm:$0xff]  ;;  %v277_v36 = vld [vmem:[#allocation5 + $0x690] sm:$0xff] }
  0x2f   :  { %503 = vmatpush.msrb.mxu2 %v113_v63  ;;  %458 = vmatpush.msra.mxu3 %v211_v1  ;;  %v328_v37 = vld [vmem:[#allocation5 + $0x828] sm:$0xff]  ;;  %v86_v38 = vld [vmem:[#allocation5 + $0x98] sm:$0xff]  ;;  %v137_v39 = vld [vmem:[#allocation5 + $0x230] sm:$0xff] }
  0x30   :  { %464 = vmatpush.msrb.mxu0 %v301_v2  ;;  %483 = vmatpush.msrb.mxu1 %v352_v3  ;;  %v274_v40 = vld [vmem:[#allocation5 + $0x678] sm:$0xff]  ;;  %v325_v41 = vld [vmem:[#allocation5 + $0x810] sm:$0xff]  ;;  %v83_v43 = vld [vmem:[#allocation5 + $0x80] sm:$0xff] }
  0x31   :  { %504 = vmatpush.msrb.mxu2 %v110_v4  ;;  %523 = vmatpush.msrb.mxu3 %v161_v5  ;;  %v66_v42 = vld [vmem:[#allocation3 + $0x10] sm:$0x77]  ;;  %v271_v45 = vld [vmem:[#allocation5 + $0x660] sm:$0xff]  ;;  %v80_v47 = vld [vmem:[#allocation5 + $0x68] sm:$0xff] }
  0x32   :  { %465 = vmatpush.msrb.mxu0 %v298_v6  ;;  %484 = vmatpush.msrb.mxu1 %v349_v7  ;;  %v134_v44 = vld [vmem:[#allocation5 + $0x218] sm:$0xff]  ;;  %370 = vst [vmem:[#allocation1 + $0x20] ss:$2 sm:$0xff] %v66_v42  ;;  %v131_v48 = vld [vmem:[#allocation5 + $0x200] sm:$0xff]  ;;  %v268_v49 = vld [vmem:[#allocation5 + $0x648] sm:$0xff] }
  0x33   :  { %505 = vmatpush.msrb.mxu2 %v107_v8  ;;  %524 = vmatpush.msrb.mxu3 %v158_v9  ;;  %v322_v46 = vld [vmem:[#allocation5 + $0x7f8] sm:$0xff]  ;;  %v319_v50 = vld [vmem:[#allocation5 + $0x7e0] sm:$0xff]  ;;  %v77_v51 = vld [vmem:[#allocation5 + $0x50] sm:$0xff] }
  0x34   :  { %466 = vmatpush.msrb.mxu0 %v295_v10  ;;  %485 = vmatpush.msrb.mxu1 %v346_v11  ;;  %v128_v52 = vld [vmem:[#allocation5 + $0x1e8] sm:$0xff]  ;;  %v265_v53 = vld [vmem:[#allocation5 + $0x630] sm:$0xff]  ;;  %v74_v55 = vld [vmem:[#allocation5 + $0x38] sm:$0xff] }
  0x35   :  { %506 = vmatpush.msrb.mxu2 %v104_v12  ;;  %525 = vmatpush.msrb.mxu3 %v155_v13  ;;  %v316_v54 = vld [vmem:[#allocation5 + $0x7c8] sm:$0xff]  ;;  %v125_v56 = vld [vmem:[#allocation5 + $0x1d0] sm:$0xff]  ;;  %v262_v57 = vld [vmem:[#allocation5 + $0x618] sm:$0xff] }
  0x36   :  { %467 = vmatpush.msrb.mxu0 %v292_v14  ;;  %486 = vmatpush.msrb.mxu1 %v343_v15  ;;  %v313_v58 = vld [vmem:[#allocation5 + $0x7b0] sm:$0xff]  ;;  %v71_v59 = vld [vmem:[#allocation5 + $0x20] sm:$0xff]  ;;  %v122_v60 = vld [vmem:[#allocation5 + $0x1b8] sm:$0xff] }
  0x37   :  { %507 = vmatpush.msrb.mxu2 %v101_v16  ;;  %526 = vmatpush.msrb.mxu3 %v152_v17  ;;  %v924_v61 = vld.sshfl [vmem:[#allocation1 + $0x10] sm:$0xff pattern:$0x75316420]  ;;  %v259_v62 = vld [vmem:[#allocation5 + $0x600] sm:$0xff]  ;;  %v310_v63 = vld [vmem:[#allocation5 + $0x798] sm:$0xff] }
  0x38   :  { %468 = vmatpush.msrb.mxu0 %v289_v18  ;;  %487 = vmatpush.msrb.mxu1 %v340_v19  ;;  %v68_v0 = vld [vmem:[#allocation5 + $0x8] sm:$0xff]  ;;  %v119_v1 = vld [vmem:[#allocation5 + $0x1a0] sm:$0xff]  ;;  %v929_v3 = vld.sshfl [vmem:[#allocation1 + $0x18] sm:$0xff pattern:$0x75316420] }
  0x39   :  { %508 = vmatpush.msrb.mxu2 %v98_v20  ;;  %527 = vmatpush.msrb.mxu3 %v149_v21  ;;  %v926_v2 = vld.sshfl [vmem:[#allocation1] sm:$0xff pattern:$0x75316420]  ;;  %v209_v4 = vld [vmem:[#allocation5 + $0x470] sm:$0xff]  ;;  %v116_v7 = vld [vmem:[#allocation5 + $0x188] sm:$0xff] }
  0x3a   :  { %469 = vmatpush.msrb.mxu0 %v286_v23  ;;  %488 = vmatpush.msrb.mxu1 %v337_v24  ;;  %v305_v5 = vld [vmem:[#allocation5 + $0x770] sm:$0xff]  ;;  %v307_v6 = vld [vmem:[#allocation5 + $0x780] sm:$0xff]  ;;  %v932_v8 = vld.sshfl [vmem:[#allocation1 + $0x8] sm:$0xff pattern:$0x75316420] }
  0x3b   :  { %509 = vmatpush.msrb.mxu2 %v95_v25  ;;  %528 = vmatpush.msrb.mxu3 %v146_v26  ;;  %v206_v9 = vld [vmem:[#allocation5 + $0x458] sm:$0xff]  ;;  %v257_v10 = vld [vmem:[#allocation5 + $0x5f0] sm:$0xff]  ;;  %v203_v13 = vld [vmem:[#allocation5 + $0x440] sm:$0xff] }
  0x3c   :  { %470 = vmatpush.msrb.mxu0 %v283_v28  ;;  %489 = vmatpush.msrb.mxu1 %v334_v29  ;;  %v302_v11 = vld [vmem:[#allocation5 + $0x758] sm:$0xff]  ;;  %v353_v12 = vld [vmem:[#allocation5 + $0x8f0] sm:$0xff]  ;;  %v299_v15 = vld [vmem:[#allocation5 + $0x740] sm:$0xff] }
  0x3d   :  { %510 = vmatpush.msrb.mxu2 %v92_v30  ;;  %529 = vmatpush.msrb.mxu3 %v143_v31  ;;  %v254_v14 = vld [vmem:[#allocation5 + $0x5d8] sm:$0xff]  ;;  %v200_v17 = vld [vmem:[#allocation5 + $0x428] sm:$0xff]  ;;  %v251_v18 = vld [vmem:[#allocation5 + $0x5c0] sm:$0xff] }
  0x3e   :  { %471 = vmatpush.msrb.mxu0 %v280_v32  ;;  %490 = vmatpush.msrb.mxu1 %v331_v33  ;;  %v350_v16 = vld [vmem:[#allocation5 + $0x8d8] sm:$0xff]  ;;  %v296_v19 = vld [vmem:[#allocation5 + $0x728] sm:$0xff]  ;;  %v347_v20 = vld [vmem:[#allocation5 + $0x8c0] sm:$0xff] }
  0x3f   :  { %511 = vmatpush.msrb.mxu2 %v89_v34  ;;  %530 = vmatpush.msrb.mxu3 %v140_v35  ;;  %v936_v21 = vld.sshfl [vmem:[#allocation1 + $0x20] sm:$0xff pattern:$0x75316420]  ;;  %v248_v22 = vld [vmem:[#allocation5 + $0x5a8] sm:$0xff]  ;;  %v197_v23 = vld [vmem:[#allocation5 + $0x410] sm:$0xff] }
  0x40   :  { %472 = vmatpush.msrb.mxu0 %v277_v36  ;;  %491 = vmatpush.msrb.mxu1 %v328_v37  ;;  %v293_v24 = vld [vmem:[#allocation5 + $0x710] sm:$0xff]  ;;  %v344_v25 = vld [vmem:[#allocation5 + $0x8a8] sm:$0xff]  ;;  %v194_v27 = vld [vmem:[#allocation5 + $0x3f8] sm:$0xff] }
  0x41   :  { %512 = vmatpush.msrb.mxu2 %v86_v38  ;;  %531 = vmatpush.msrb.mxu3 %v137_v39  ;;  %v938_v26 = vld.sshfl [vmem:[#allocation1 + $0x28] sm:$0xff pattern:$0x75316420]  ;;  %v245_v28 = vld [vmem:[#allocation5 + $0x590] sm:$0xff]  ;;  %v290_v29 = vld [vmem:[#allocation5 + $0x6f8] sm:$0xff] }
  0x42   :  { %473 = vmatpush.msrb.mxu0 %v274_v40  ;;  %492 = vmatpush.msrb.mxu1 %v325_v41  ;;  %v341_v30 = vld [vmem:[#allocation5 + $0x890] sm:$0xff]  ;;  %v191_v31 = vld [vmem:[#allocation5 + $0x3e0] sm:$0xff]  ;;  %v242_v32 = vld [vmem:[#allocation5 + $0x578] sm:$0xff] }
  0x43   :  { %513 = vmatpush.msrb.mxu2 %v83_v43  ;;  %532 = vmatpush.msrb.mxu3 %v134_v44  ;;  %v287_v33 = vld [vmem:[#allocation5 + $0x6e0] sm:$0xff]  ;;  %v338_v34 = vld [vmem:[#allocation5 + $0x878] sm:$0xff]  ;;  %v188_v35 = vld [vmem:[#allocation5 + $0x3c8] sm:$0xff] }
  0x44   :  { %474 = vmatpush.msrb.mxu0 %v271_v45  ;;  %493 = vmatpush.msrb.mxu1 %v322_v46  ;;  %v239_v36 = vld [vmem:[#allocation5 + $0x560] sm:$0xff]  ;;  %v284_v37 = vld [vmem:[#allocation5 + $0x6c8] sm:$0xff]  ;;  %v185_v39 = vld [vmem:[#allocation5 + $0x3b0] sm:$0xff] }
  0x45   :  { %514 = vmatpush.msrb.mxu2 %v80_v47  ;;  %533 = vmatpush.msrb.mxu3 %v131_v48  ;;  %v335_v38 = vld [vmem:[#allocation5 + $0x860] sm:$0xff]  ;;  %v236_v40 = vld [vmem:[#allocation5 + $0x548] sm:$0xff]  ;;  %v281_v41 = vld [vmem:[#allocation5 + $0x6b0] sm:$0xff] }
  0x46   :  { %475 = vmatpush.msrb.mxu0 %v268_v49  ;;  %494 = vmatpush.msrb.mxu1 %v319_v50  ;;  %v332_v42 = vld [vmem:[#allocation5 + $0x848] sm:$0xff]  ;;  %v182_v43 = vld [vmem:[#allocation5 + $0x398] sm:$0xff]  ;;  %v233_v44 = vld [vmem:[#allocation5 + $0x530] sm:$0xff] }
  0x47   :  { %515 = vmatpush.msrb.mxu2 %v77_v51  ;;  %534 = vmatpush.msrb.mxu3 %v128_v52  ;;  %v278_v45 = vld [vmem:[#allocation5 + $0x698] sm:$0xff]  ;;  %v329_v46 = vld [vmem:[#allocation5 + $0x830] sm:$0xff]  ;;  %v179_v47 = vld [vmem:[#allocation5 + $0x380] sm:$0xff] }
  0x48   :  { %476 = vmatpush.msrb.mxu0 %v265_v53  ;;  %495 = vmatpush.msrb.mxu1 %v316_v54  ;;  %v230_v48 = vld [vmem:[#allocation5 + $0x518] sm:$0xff]  ;;  %v275_v49 = vld [vmem:[#allocation5 + $0x680] sm:$0xff]  ;;  %v176_v51 = vld [vmem:[#allocation5 + $0x368] sm:$0xff] }
  0x49   :  { %516 = vmatpush.msrb.mxu2 %v74_v55  ;;  %535 = vmatpush.msrb.mxu3 %v125_v56  ;;  %v326_v50 = vld [vmem:[#allocation5 + $0x818] sm:$0xff]  ;;  %v227_v52 = vld [vmem:[#allocation5 + $0x500] sm:$0xff]  ;;  %v272_v53 = vld [vmem:[#allocation5 + $0x668] sm:$0xff] }
  0x4a   :  { %477 = vmatpush.msrb.mxu0 %v262_v57  ;;  %496 = vmatpush.msrb.mxu1 %v313_v58  ;;  %v323_v54 = vld [vmem:[#allocation5 + $0x800] sm:$0xff]  ;;  %v173_v55 = vld [vmem:[#allocation5 + $0x350] sm:$0xff]  ;;  %v224_v56 = vld [vmem:[#allocation5 + $0x4e8] sm:$0xff] }
  0x4b   :  { %517 = vmatpush.msrb.mxu2 %v71_v59  ;;  %536 = vmatpush.msrb.mxu3 %v122_v60  ;;  %v269_v57 = vld [vmem:[#allocation5 + $0x650] sm:$0xff]  ;;  %v320_v58 = vld [vmem:[#allocation5 + $0x7e8] sm:$0xff]  ;;  %v170_v59 = vld [vmem:[#allocation5 + $0x338] sm:$0xff] }
  0x4c   :  { %439 = vmatmul.f32.vlgmr.msra.gmra.mxu2 %v924_v61  ;;  %478 = vmatpush.msrb.mxu0 %v259_v62  ;;  %v221_v60 = vld [vmem:[#allocation5 + $0x4d0] sm:$0xff]  ;;  %v266_v62 = vld [vmem:[#allocation5 + $0x638] sm:$0xff] }
  0x4d   :  { %497 = vmatpush.msrb.mxu1 %v310_v63  ;;  %518 = vmatpush.msrb.mxu2 %v68_v0  ;;  %v317_v63 = vld [vmem:[#allocation5 + $0x7d0] sm:$0xff]  ;;  %v167_v0 = vld [vmem:[#allocation5 + $0x320] sm:$0xff] }
  0x4e   :  { %537 = vmatpush.msrb.mxu3 %v119_v1  ;;  %399 = vmatmul.f32.vlgmr.msra.gmra.mxu0 %v926_v2  ;;  %v218_v1 = vld [vmem:[#allocation5 + $0x4b8] sm:$0xff] }
  0x4f   :  { %459 = vmatmul.f32.vlgmr.msra.gmra.mxu3 %v929_v3  ;;  %543 = vmatpush.msra.mxu0 %v209_v4  ;;  %v263_v4 = vld [vmem:[#allocation5 + $0x620] sm:$0xff] }
  0x50   :  { %583 = vmatpush.msra.mxu2 %v305_v5  ;;  %498 = vmatpush.msrb.mxu1 %v307_v6  ;;  %v314_v5 = vld [vmem:[#allocation5 + $0x7b8] sm:$0xff]  ;;  %v164_v6 = vld [vmem:[#allocation5 + $0x308] sm:$0xff] }
  0x51   :  { %538 = vmatpush.msrb.mxu3 %v116_v7  ;;  %419 = vmatmul.f32.vlgmr.msra.gmra.mxu1 %v932_v8  ;;  %v215_v7 = vld [vmem:[#allocation5 + $0x4a0] sm:$0xff] }
  0x52   :  { %544 = vmatpush.msra.mxu0 %v206_v9  ;;  %563 = vmatpush.msra.mxu1 %v257_v10  ;;  %v260_v9 = vld [vmem:[#allocation5 + $0x608] sm:$0xff]  ;;  %v311_v10 = vld [vmem:[#allocation5 + $0x7a0] sm:$0xff] }
  0x53   :  { %584 = vmatpush.msra.mxu2 %v302_v11  ;;  %603 = vmatpush.msra.mxu3 %v353_v12  ;;  %v114_v11 = vld [vmem:[#allocation5 + $0x178] sm:$0xff]  ;;  %v212_v12 = vld [vmem:[#allocation5 + $0x488] sm:$0xff] }
  0x54   :  { %545 = vmatpush.msra.mxu0 %v203_v13  ;;  %564 = vmatpush.msra.mxu1 %v254_v14  ;;  %v308_v13 = vld [vmem:[#allocation5 + $0x788] sm:$0xff]  ;;  %v111_v14 = vld [vmem:[#allocation5 + $0x160] sm:$0xff] }
  0x55   :  { %585 = vmatpush.msra.mxu2 %v299_v15  ;;  %604 = vmatpush.msra.mxu3 %v350_v16  ;;  %v162_v15 = vld [vmem:[#allocation5 + $0x2f8] sm:$0xff] }
  0x56   :  { %546 = vmatpush.msra.mxu0 %v200_v17  ;;  %565 = vmatpush.msra.mxu1 %v251_v18  ;;  %v210_v16 = vld [vmem:[#allocation5 + $0x478] sm:$0xff]  ;;  %v108_v17 = vld [vmem:[#allocation5 + $0x148] sm:$0xff]  ;;  %v159_v18 = vld [vmem:[#allocation5 + $0x2e0] sm:$0xff] }
  0x57   :  { %586 = vmatpush.msra.mxu2 %v296_v19  ;;  %605 = vmatpush.msra.mxu3 %v347_v20  ;;  %v207_v19 = vld [vmem:[#allocation5 + $0x460] sm:$0xff]  ;;  %v258_v20 = vld [vmem:[#allocation5 + $0x5f8] sm:$0xff] }
  0x58   :  { %479 = vmatmul.f32.vlgmr.msrb.gmra.mxu0 %v936_v21  ;;  %566 = vmatpush.msra.mxu1 %v248_v22  ;;  %v105_v22 = vld [vmem:[#allocation5 + $0x130] sm:$0xff] }
  0x59   :  { %547 = vmatpush.msra.mxu0 %v197_v23  ;;  %587 = vmatpush.msra.mxu2 %v293_v24  ;;  %v156_v23 = vld [vmem:[#allocation5 + $0x2c8] sm:$0xff] }
  0x5a   :  { %606 = vmatpush.msra.mxu3 %v344_v25  ;;  %499 = vmatmul.f32.vlgmr.msrb.gmra.mxu1 %v938_v26  ;;  %v204_v24 = vld [vmem:[#allocation5 + $0x448] sm:$0xff]  ;;  %v255_v25 = vld [vmem:[#allocation5 + $0x5e0] sm:$0xff] }
  0x5b   :  { %548 = vmatpush.msra.mxu0 %v194_v27  ;;  %567 = vmatpush.msra.mxu1 %v245_v28  ;;  %v102_v27 = vld [vmem:[#allocation5 + $0x118] sm:$0xff]  ;;  %v153_v28 = vld [vmem:[#allocation5 + $0x2b0] sm:$0xff] }
  0x5c   :  { %588 = vmatpush.msra.mxu2 %v290_v29  ;;  %607 = vmatpush.msra.mxu3 %v341_v30  ;;  %v201_v29 = vld [vmem:[#allocation5 + $0x430] sm:$0xff]  ;;  %v252_v30 = vld [vmem:[#allocation5 + $0x5c8] sm:$0xff] }
  0x5d   :  { %549 = vmatpush.msra.mxu0 %v191_v31  ;;  %568 = vmatpush.msra.mxu1 %v242_v32  ;;  %v99_v31 = vld [vmem:[#allocation5 + $0x100] sm:$0xff]  ;;  %v150_v32 = vld [vmem:[#allocation5 + $0x298] sm:$0xff] }
  0x5e   :  { %589 = vmatpush.msra.mxu2 %v287_v33  ;;  %608 = vmatpush.msra.mxu3 %v338_v34  ;;  %v198_v33 = vld [vmem:[#allocation5 + $0x418] sm:$0xff]  ;;  %v249_v34 = vld [vmem:[#allocation5 + $0x5b0] sm:$0xff] }
  0x5f   :  { %550 = vmatpush.msra.mxu0 %v188_v35  ;;  %569 = vmatpush.msra.mxu1 %v239_v36  ;;  %v96_v35 = vld [vmem:[#allocation5 + $0xe8] sm:$0xff]  ;;  %v147_v36 = vld [vmem:[#allocation5 + $0x280] sm:$0xff] }
  0x60   :  { %590 = vmatpush.msra.mxu2 %v284_v37  ;;  %609 = vmatpush.msra.mxu3 %v335_v38  ;;  %v195_v37 = vld [vmem:[#allocation5 + $0x400] sm:$0xff]  ;;  %v246_v38 = vld [vmem:[#allocation5 + $0x598] sm:$0xff] }
  0x61   :  { %551 = vmatpush.msra.mxu0 %v185_v39  ;;  %570 = vmatpush.msra.mxu1 %v236_v40  ;;  %v93_v39 = vld [vmem:[#allocation5 + $0xd0] sm:$0xff]  ;;  %v144_v40 = vld [vmem:[#allocation5 + $0x268] sm:$0xff] }
  0x62   :  { %591 = vmatpush.msra.mxu2 %v281_v41  ;;  %610 = vmatpush.msra.mxu3 %v332_v42  ;;  %v192_v41 = vld [vmem:[#allocation5 + $0x3e8] sm:$0xff]  ;;  %v243_v42 = vld [vmem:[#allocation5 + $0x580] sm:$0xff] }
  0x63   :  { %552 = vmatpush.msra.mxu0 %v182_v43  ;;  %571 = vmatpush.msra.mxu1 %v233_v44  ;;  %v90_v43 = vld [vmem:[#allocation5 + $0xb8] sm:$0xff]  ;;  %v141_v44 = vld [vmem:[#allocation5 + $0x250] sm:$0xff] }
  0x64   :  { %592 = vmatpush.msra.mxu2 %v278_v45  ;;  %611 = vmatpush.msra.mxu3 %v329_v46  ;;  %v189_v45 = vld [vmem:[#allocation5 + $0x3d0] sm:$0xff]  ;;  %v240_v46 = vld [vmem:[#allocation5 + $0x568] sm:$0xff] }
  0x65   :  { %553 = vmatpush.msra.mxu0 %v179_v47  ;;  %572 = vmatpush.msra.mxu1 %v230_v48  ;;  %v87_v47 = vld [vmem:[#allocation5 + $0xa0] sm:$0xff]  ;;  %v138_v48 = vld [vmem:[#allocation5 + $0x238] sm:$0xff] }
  0x66   :  { %593 = vmatpush.msra.mxu2 %v275_v49  ;;  %612 = vmatpush.msra.mxu3 %v326_v50  ;;  %v186_v49 = vld [vmem:[#allocation5 + $0x3b8] sm:$0xff]  ;;  %v237_v50 = vld [vmem:[#allocation5 + $0x550] sm:$0xff] }
  0x67   :  { %554 = vmatpush.msra.mxu0 %v176_v51  ;;  %573 = vmatpush.msra.mxu1 %v227_v52  ;;  %v84_v51 = vld [vmem:[#allocation5 + $0x88] sm:$0xff]  ;;  %v135_v52 = vld [vmem:[#allocation5 + $0x220] sm:$0xff] }
  0x68   :  { %594 = vmatpush.msra.mxu2 %v272_v53  ;;  %613 = vmatpush.msra.mxu3 %v323_v54  ;;  %v183_v53 = vld [vmem:[#allocation5 + $0x3a0] sm:$0xff]  ;;  %v234_v54 = vld [vmem:[#allocation5 + $0x538] sm:$0xff] }
  0x69   :  { %519 = vmatmul.f32.vlgmr.msrb.gmra.mxu2 %v926_v2  ;;  %555 = vmatpush.msra.mxu0 %v173_v55  ;;  %v81_v55 = vld [vmem:[#allocation5 + $0x70] sm:$0xff] }
  0x6a   :  { %574 = vmatpush.msra.mxu1 %v224_v56  ;;  %595 = vmatpush.msra.mxu2 %v269_v57  ;;  %v132_v56 = vld [vmem:[#allocation5 + $0x208] sm:$0xff] }
  0x6b   :  { %614 = vmatpush.msra.mxu3 %v320_v58  ;;  %556 = vmatpush.msra.mxu0 %v170_v59  ;;  %v180_v57 = vld [vmem:[#allocation5 + $0x388] sm:$0xff]  ;;  %v231_v58 = vld [vmem:[#allocation5 + $0x520] sm:$0xff]  ;;  %v78_v59 = vld [vmem:[#allocation5 + $0x58] sm:$0xff] }
  0x6c   :  { %539 = vmatmul.f32.vlgmr.msrb.gmra.mxu3 %v932_v8  ;;  %575 = vmatpush.msra.mxu1 %v221_v60  ;;  %v129_v60 = vld [vmem:[#allocation5 + $0x1f0] sm:$0xff] }
  0x6d   :  { %596 = vmatpush.msra.mxu2 %v266_v62  ;;  %615 = vmatpush.msra.mxu3 %v317_v63  ;;  %v177_v62 = vld [vmem:[#allocation5 + $0x370] sm:$0xff]  ;;  %v228_v63 = vld [vmem:[#allocation5 + $0x508] sm:$0xff] }
  0x6e   :  { %557 = vmatpush.msra.mxu0 %v167_v0  ;;  %576 = vmatpush.msra.mxu1 %v218_v1  ;;  %v75_v0 = vld [vmem:[#allocation5 + $0x40] sm:$0xff]  ;;  %v126_v1 = vld [vmem:[#allocation5 + $0x1d8] sm:$0xff] }
  0x6f   :  { %597 = vmatpush.msra.mxu2 %v263_v4  ;;  %616 = vmatpush.msra.mxu3 %v314_v5  ;;  %v174_v4 = vld [vmem:[#allocation5 + $0x358] sm:$0xff]  ;;  %v225_v5 = vld [vmem:[#allocation5 + $0x4f0] sm:$0xff] }
  0x70   :  { %558 = vmatpush.msra.mxu0 %v164_v6  ;;  %577 = vmatpush.msra.mxu1 %v215_v7  ;;  %v72_v6 = vld [vmem:[#allocation5 + $0x28] sm:$0xff]  ;;  %v123_v7 = vld [vmem:[#allocation5 + $0x1c0] sm:$0xff] }
  0x71   :  { %598 = vmatpush.msra.mxu2 %v260_v9  ;;  %617 = vmatpush.msra.mxu3 %v311_v10  ;;  %v171_v9 = vld [vmem:[#allocation5 + $0x340] sm:$0xff]  ;;  %v222_v10 = vld [vmem:[#allocation5 + $0x4d8] sm:$0xff] }
  0x72   :  { %599 = vmatmul.f32.vlgmr.msra.gmra.mxu2 %v936_v21  ;;  %623 = vmatpush.msrb.mxu0 %v114_v11  ;;  %v69_v11 = vld [vmem:[#allocation5 + $0x10] sm:$0xff] }
  0x73   :  { %578 = vmatpush.msra.mxu1 %v212_v12  ;;  %618 = vmatpush.msra.mxu3 %v308_v13  ;;  %v120_v12 = vld [vmem:[#allocation5 + $0x1a8] sm:$0xff]  ;;  %v306_v13 = vld [vmem:[#allocation5 + $0x778] sm:$0xff] }
  0x74   :  { %559 = vmatmul.f32.vlgmr.msra.gmra.mxu0 %v924_v61  ;;  %619 = vmatmul.f32.vlgmr.msra.gmra.mxu3 %v938_v26 }
  0x75   :  { %624 = vmatpush.msrb.mxu0 %v111_v14  ;;  %643 = vmatpush.msrb.mxu1 %v162_v15  ;;  %v168_v14 = vld [vmem:[#allocation5 + $0x328] sm:$0xff]  ;;  %v117_v15 = vld [vmem:[#allocation5 + $0x190] sm:$0xff] }
  0x76   :  { %579 = vmatmul.f32.vlgmr.msra.gmra.mxu1 %v929_v3  ;;  %663 = vmatpush.msrb.mxu2 %v210_v16  ;;  %v219_v16 = vld [vmem:[#allocation5 + $0x4c0] sm:$0xff] }
  0x77   :  { %625 = vmatpush.msrb.mxu0 %v108_v17  ;;  %644 = vmatpush.msrb.mxu1 %v159_v18  ;;  %v303_v17 = vld [vmem:[#allocation5 + $0x760] sm:$0xff]  ;;  %v354_v18 = vld [vmem:[#allocation5 + $0x8f8] sm:$0xff] }
  0x78   :  { %664 = vmatpush.msrb.mxu2 %v207_v19  ;;  %683 = vmatpush.msrb.mxu3 %v258_v20  ;;  %v165_v19 = vld [vmem:[#allocation5 + $0x310] sm:$0xff]  ;;  %v216_v20 = vld [vmem:[#allocation5 + $0x4a8] sm:$0xff] }
  0x79   :  { %626 = vmatpush.msrb.mxu0 %v105_v22  ;;  %645 = vmatpush.msrb.mxu1 %v156_v23  ;;  %v300_v22 = vld [vmem:[#allocation5 + $0x748] sm:$0xff]  ;;  %v351_v23 = vld [vmem:[#allocation5 + $0x8e0] sm:$0xff] }
  0x7a   :  { %665 = vmatpush.msrb.mxu2 %v204_v24  ;;  %684 = vmatpush.msrb.mxu3 %v255_v25  ;;  %v213_v24 = vld [vmem:[#allocation5 + $0x490] sm:$0xff] }
  0x7b   :  { %627 = vmatpush.msrb.mxu0 %v102_v27  ;;  %646 = vmatpush.msrb.mxu1 %v153_v28  ;;  %v297_v25 = vld [vmem:[#allocation5 + $0x730] sm:$0xff]  ;;  %v348_v27 = vld [vmem:[#allocation5 + $0x8c8] sm:$0xff]  ;;  %v294_v28 = vld [vmem:[#allocation5 + $0x718] sm:$0xff] }
  0x7c   :  { %666 = vmatpush.msrb.mxu2 %v201_v29  ;;  %685 = vmatpush.msrb.mxu3 %v252_v30  ;;  %v345_v29 = vld [vmem:[#allocation5 + $0x8b0] sm:$0xff]  ;;  %v291_v30 = vld [vmem:[#allocation5 + $0x700] sm:$0xff] }
  0x7d   :  { %628 = vmatpush.msrb.mxu0 %v99_v31  ;;  %647 = vmatpush.msrb.mxu1 %v150_v32  ;;  %v342_v31 = vld [vmem:[#allocation5 + $0x898] sm:$0xff]  ;;  %v288_v32 = vld [vmem:[#allocation5 + $0x6e8] sm:$0xff] }
  0x7e   :  { %667 = vmatpush.msrb.mxu2 %v198_v33  ;;  %686 = vmatpush.msrb.mxu3 %v249_v34  ;;  %v339_v33 = vld [vmem:[#allocation5 + $0x880] sm:$0xff]  ;;  %v285_v34 = vld [vmem:[#allocation5 + $0x6d0] sm:$0xff] }
  0x7f   :  { %629 = vmatpush.msrb.mxu0 %v96_v35  ;;  %648 = vmatpush.msrb.mxu1 %v147_v36  ;;  %v336_v35 = vld [vmem:[#allocation5 + $0x868] sm:$0xff]  ;;  %v333_v36 = vld [vmem:[#allocation5 + $0x850] sm:$0xff] }
  0x80   :  { %668 = vmatpush.msrb.mxu2 %v195_v37  ;;  %687 = vmatpush.msrb.mxu3 %v246_v38  ;;  %v279_v37 = vld [vmem:[#allocation5 + $0x6a0] sm:$0xff] }
  0x81   :  { %630 = vmatpush.msrb.mxu0 %v93_v39  ;;  %649 = vmatpush.msrb.mxu1 %v144_v40  ;;  %v327_v38 = vld [vmem:[#allocation5 + $0x820] sm:$0xff]  ;;  %v273_v39 = vld [vmem:[#allocation5 + $0x670] sm:$0xff]  ;;  %v270_v40 = vld [vmem:[#allocation5 + $0x658] sm:$0xff] }
  0x82   :  { %669 = vmatpush.msrb.mxu2 %v192_v41  ;;  %688 = vmatpush.msrb.mxu3 %v243_v42  ;;  %v321_v41 = vld [vmem:[#allocation5 + $0x7f0] sm:$0xff]  ;;  %v267_v42 = vld [vmem:[#allocation5 + $0x640] sm:$0xff] }
  0x83   :  { %631 = vmatpush.msrb.mxu0 %v90_v43  ;;  %650 = vmatpush.msrb.mxu1 %v141_v44  ;;  %v318_v43 = vld [vmem:[#allocation5 + $0x7d8] sm:$0xff]  ;;  %v264_v44 = vld [vmem:[#allocation5 + $0x628] sm:$0xff] }
  0x84   :  { %670 = vmatpush.msrb.mxu2 %v189_v45  ;;  %689 = vmatpush.msrb.mxu3 %v240_v46  ;;  %v315_v45 = vld [vmem:[#allocation5 + $0x7c0] sm:$0xff]  ;;  %v261_v46 = vld [vmem:[#allocation5 + $0x610] sm:$0xff] }
  0x85   :  { %632 = vmatpush.msrb.mxu0 %v87_v47  ;;  %651 = vmatpush.msrb.mxu1 %v138_v48  ;;  %v312_v47 = vld [vmem:[#allocation5 + $0x7a8] sm:$0xff]  ;;  %v309_v48 = vld [vmem:[#allocation5 + $0x790] sm:$0xff] }
  0x86   :  { %671 = vmatpush.msrb.mxu2 %v186_v49  ;;  %690 = vmatpush.msrb.mxu3 %v237_v50 }
  0x87   :  { %633 = vmatpush.msrb.mxu0 %v84_v51  ;;  %652 = vmatpush.msrb.mxu1 %v135_v52 }
  0x88   :  { %672 = vmatpush.msrb.mxu2 %v183_v53  ;;  %691 = vmatpush.msrb.mxu3 %v234_v54  ;;  %v355_v54 = vld [vmem:[%s965_s2] sm:$0x7] }
  0x89   :  { %634 = vmatpush.msrb.mxu0 %v81_v55  ;;  %653 = vmatpush.msrb.mxu1 %v132_v56  ;;  %v358_v55 = vperm.slane %v355_v54, 1 }
  0x8a   :  { %673 = vmatpush.msrb.mxu2 %v180_v57  ;;  %692 = vmatpush.msrb.mxu3 %v231_v58  ;;  %v357_v58 = vperm.slane %v355_v54, 0 }
  0x8b   :  { %635 = vmatpush.msrb.mxu0 %v78_v59  ;;  %654 = vmatpush.msrb.mxu1 %v129_v60 }
  0x8c   :  { %674 = vmatpush.msrb.mxu2 %v177_v62  ;;  %693 = vmatpush.msrb.mxu3 %v228_v63 }
  0x8d   :  { %636 = vmatpush.msrb.mxu0 %v75_v0  ;;  %655 = vmatpush.msrb.mxu1 %v126_v1 }
  0x8e   :  { %675 = vmatpush.msrb.mxu2 %v174_v4  ;;  %694 = vmatpush.msrb.mxu3 %v225_v5  ;;  %v359_v4 = vperm.slane %v355_v54, 2 }
  0x8f   :  { %637 = vmatpush.msrb.mxu0 %v72_v6  ;;  %656 = vmatpush.msrb.mxu1 %v123_v7 }
  0x90   :  { %676 = vmatpush.msrb.mxu2 %v171_v9  ;;  %695 = vmatpush.msrb.mxu3 %v222_v10 }
  0x91   :  { %638 = vmatpush.msrb.mxu0 %v69_v11  ;;  %657 = vmatpush.msrb.mxu1 %v120_v12 }
  0x92   :  { %677 = vmatpush.msrb.mxu2 %v168_v14  ;;  %696 = vmatpush.msrb.mxu3 %v219_v16 }
  0x93   :  { %703 = vmatpush.msra.mxu0 %v306_v13  ;;  %658 = vmatpush.msrb.mxu1 %v117_v15 }
  0x94   :  { %678 = vmatpush.msrb.mxu2 %v165_v19  ;;  %697 = vmatpush.msrb.mxu3 %v216_v20 }
  0x95   :  { %704 = vmatpush.msra.mxu0 %v303_v17  ;;  %723 = vmatpush.msra.mxu1 %v354_v18 }
  0x96   :  { %679 = vmatmul.f32.vlgmr.msrb.gmra.mxu2 %v924_v61  ;;  %698 = vmatpush.msrb.mxu3 %v213_v24  ;;  %v282_v61 = vld [vmem:[#allocation5 + $0x6b8] sm:$0xff] }
  0x97   :  { %705 = vmatpush.msra.mxu0 %v300_v22  ;;  %724 = vmatpush.msra.mxu1 %v351_v23  ;;  %v746_v23 = vld [vmem:[#allocation7] sm:$0x7] }
  0x98   :  { %639 = vmatmul.f32.vlgmr.msrb.gmra.mxu0 %v926_v2  ;;  %699 = vmatmul.f32.vlgmr.msrb.gmra.mxu3 %v929_v3  ;;  %v330_v2 = vld [vmem:[#allocation5 + $0x838] sm:$0xff]  ;;  %v276_v3 = vld [vmem:[#allocation5 + $0x688] sm:$0xff] }
  0x99   :  { %706 = vmatpush.msra.mxu0 %v297_v25  ;;  %725 = vmatpush.msra.mxu1 %v348_v27  ;;  %v749_v25 = vperm.slane %v746_v23, 1 }
  0x9a   :  { %659 = vmatmul.f32.vlgmr.msrb.gmra.mxu1 %v932_v8  ;;  %v324_v8 = vld [vmem:[#allocation5 + $0x808] sm:$0xff] }
  0x9b   :  { %707 = vmatpush.msra.mxu0 %v294_v28  ;;  %726 = vmatpush.msra.mxu1 %v345_v29  ;;  %v748_v29 = vperm.slane %v746_v23, 0 }
  0x9d   :  { %708 = vmatpush.msra.mxu0 %v291_v30  ;;  %727 = vmatpush.msra.mxu1 %v342_v31 }
  0x9f   :  { %709 = vmatpush.msra.mxu0 %v288_v32  ;;  %728 = vmatpush.msra.mxu1 %v339_v33 }
  0xa1   :  { %710 = vmatpush.msra.mxu0 %v285_v34  ;;  %729 = vmatpush.msra.mxu1 %v336_v35 }
  0xa3   :  { %711 = vmatpush.msra.mxu0 %v282_v61  ;;  %730 = vmatpush.msra.mxu1 %v333_v36  ;;  %v750_v61 = vperm.slane %v746_v23, 2 }
  0xa5   :  { %712 = vmatpush.msra.mxu0 %v279_v37  ;;  %731 = vmatpush.msra.mxu1 %v330_v2 }
  0xa7   :  { %713 = vmatpush.msra.mxu0 %v276_v3  ;;  %732 = vmatpush.msra.mxu1 %v327_v38 }
  0xa9   :  { %714 = vmatpush.msra.mxu0 %v273_v39  ;;  %733 = vmatpush.msra.mxu1 %v324_v8 }
  0xab   :  { %715 = vmatpush.msra.mxu0 %v270_v40  ;;  %734 = vmatpush.msra.mxu1 %v321_v41  ;;  %v766_v40 = vstv %s967_s4 }
  0xad   :  { %716 = vmatpush.msra.mxu0 %v267_v42  ;;  %735 = vmatpush.msra.mxu1 %v318_v43 }
  0xaf   :  { %717 = vmatpush.msra.mxu0 %v264_v44  ;;  %736 = vmatpush.msra.mxu1 %v315_v45 }
  0xb1   :  { %718 = vmatpush.msra.mxu0 %v261_v46  ;;  %737 = vmatpush.msra.mxu1 %v312_v47 }
  0xb2   :  { %719 = vmatmul.f32.vlgmr.msra.gmra.mxu0 %v936_v21 }
  0xb3   :  { %738 = vmatpush.msra.mxu1 %v309_v48 }
  0xb4   :  { %739 = vmatmul.f32.vlgmr.msra.gmra.mxu1 %v938_v26 }
  0xcb   :  { %v400_v49 = vpop.f32.mrf.mxu0 }
  0xcc   :  { %v401_v21 = vadd.f32 %v400_v49, %v357_v58 }
  0xce   :  { %v420_v50 = vpop.f32.mrf.mxu1 }
  0xcf   :  { %v440_v51 = vpop.f32.mrf.mxu2  ;;  %v421_v26 = vadd.f32 %v420_v50, %v401_v21 }
  0xd1   :  { %v441_v7 = vadd.f32 %v440_v51, %v421_v26 }
  0xd2   :  { %v460_v52 = vpop.f32.mrf.mxu3 }
  0xd3   :  { %v461_v13 = vadd.f32 %v460_v52, %v441_v7 }
  0xd5   :  { %v480_v53 = vpop.f32.mrf.mxu0 }
  0xd6   :  { %v481_v17 = vadd.f32 %v480_v53, %v461_v13 }
  0xd7   :  { %v500_v56 = vpop.f32.mrf.mxu1 }
  0xd8   :  { %v501_v22 = vadd.f32 %v500_v56, %v481_v17 }
  0xda   :  { %v743_v28 = vmax.f32 %v501_v22, 0.0 }
  0xdc   :  { %v754_v34 = vmul.f32 %v748_v29, %v743_v28 }
  0xde   :  { %v758_v3 = vsel %vm757_vm0, %v754_v34, 0.0 }
  0xec   :  { %v520_v57 = vpop.f32.mrf.mxu2 }
  0xed   :  { %v521_v59 = vadd.f32 %v520_v57, %v358_v55 }
  0xef   :  { %v540_v60 = vpop.f32.mrf.mxu3 }
  0xf0   :  { %v541_v63 = vadd.f32 %v540_v60, %v521_v59 }
  0xf1   :  { %v560_v62 = vpop.f32.mrf.mxu0 }
  0xf2   :  { %v561_v1 = vadd.f32 %v560_v62, %v541_v63 }
  0xf3   :  { %v580_v0 = vpop.f32.mrf.mxu1 }
  0xf4   :  { %v581_v9 = vadd.f32 %v580_v0, %v561_v1 }
  0xf5   :  { %v600_v5 = vpop.f32.mrf.mxu2 }
  0xf6   :  { %v601_v14 = vadd.f32 %v600_v5, %v581_v9 }
  0xf7   :  { %v620_v11 = vpop.f32.mrf.mxu3 }
  0xf8   :  { %v621_v18 = vadd.f32 %v620_v11, %v601_v14 }
  0xfa   :  { %v744_v24 = vmax.f32 %v621_v18, 0.0 }
  0xfc   :  { %v755_v31 = vmul.f32 %v749_v25, %v744_v24 }
  0xfe   :  { %v759_v37 = vsel %vm757_vm0, %v755_v31, 0.0 }
  0xff   :  { %v760_v38 = vadd.f32 %v759_v37, %v758_v3 }
 0x115   :  { %v640_v6 = vpop.f32.mrf.mxu0 }
 0x116   :  { %v641_v10 = vadd.f32 %v640_v6, %v359_v4 }
 0x117   :  { %v660_v12 = vpop.f32.mrf.mxu1 }
 0x118   :  { %v661_v15 = vadd.f32 %v660_v12, %v641_v10 }
 0x119   :  { %v680_v16 = vpop.f32.mrf.mxu2 }
 0x11a   :  { %v681_v19 = vadd.f32 %v680_v16, %v661_v15 }
 0x11b   :  { %v700_v20 = vpop.f32.mrf.mxu3 }
 0x11c   :  { %v701_v27 = vadd.f32 %v700_v20, %v681_v19 }
 0x12f   :  { %v720_v30 = vpop.f32.mrf.mxu0 }
 0x130   :  { %v721_v32 = vadd.f32 %v720_v30, %v701_v27 }
 0x131   :  { %v740_v33 = vpop.f32.mrf.mxu1 }
 0x132   :  { %v741_v35 = vadd.f32 %v740_v33, %v721_v32 }
 0x134   :  { %v745_v36 = vmax.f32 %v741_v35, 0.0 }
 0x136   :  { %v756_v2 = vmul.f32 %v750_v61, %v745_v36 }
 0x138   :  { %v761_v39 = vsel %vm757_vm0, %v756_v2, 0.0 }
 0x139   :  { %v762_v8 = vadd.f32 %v761_v39, %v760_v38 }
 0x13b   :  { %763 = vadd.xlane.f32.xlu0 %v762_v8 }
 0x1ae   :  { %v764_v41 = vpop.xlane.xlu0 %763 }
 0x1af   :  { %v767_v42 = vadd.f32 %v766_v40, %v764_v41 }
 0x1b1   :  { %v794_v43 = vmul.f32 -1.442695, %v767_v42 }
 0x1b3   :  { %800 = vpow2.f32 %v794_v43 }
 0x1b9   :  { %v801_v44 = vpop.eup %800 }
 0x1ba   :  { %v771_v45 = vadd.f32 1.0, %v801_v44 }
 0x1bc   :  { %802 = vrcp.f32 %v771_v45  ;;  %v783_v49 = vand.u32 2147483648, %v771_v45  ;;  %v781_v51 = vand.u32 2147483647, %v771_v45  ;;  %vm777_vm2 = vweird.f32 %v771_v45 }
 0x1be   :  { %v784_v53 = vor.u32 1.1754944e-38, %v783_v49  ;;  %vm782_vm4 = vcmp.eq.f32.partialorder %v781_v51, 8.507059e+37 }
 0x1c2   :  { %v803_v46 = vpop.eup %802 }
 0x1c3   :  { %v773_v47 = vmul.f32 %v803_v46, %v771_v45  ;;  %vm778_vm1 = vweird.f32 %v803_v46 }
 0x1c4   :  { %vm779_vm3 = vmor %vm777_vm2, %vm778_vm1 }
 0x1c5   :  { %v774_v48 = vsub.f32 1.0, %v773_v47 }
 0x1c7   :  { %v775_v50 = vmul.f32 %v803_v46, %v774_v48 }
 0x1c9   :  { %v776_v52 = vadd.f32 %v803_v46, %v775_v50 }
 0x1cb   :  { %v780_v54 = vsel %vm779_vm3, %v803_v46, %v776_v52 }
 0x1cc   :  { %v785_v55 = vsel %vm782_vm4, %v784_v53, %v780_v54 }
 0x1cd   :  { %787 = vst [vmem:[%s968_s5] sm:$0x7] %v785_v55 }
 0x1ce   :  { %792 = vsyncpa [#allocation4], 1 }
 0x1cf   :  { %793 = vsyncpa [#allocation6], 1 }

</bundles_post_ra>
